<compile_context>
chip_gen: v7x
topology: tpu7x:2x2x1
jax: 0.10.0
libtpu: 0.0.40
codegen_flags: <defaults>
</compile_context>

<pallas_src>
import functools

import jax
import jax.numpy as jnp
from jax import lax
from jax.experimental import pallas as pl
from jax.experimental.pallas import tpu as pltpu

# --- module hyper-parameters (scaled down from n_embd=384 / block_size=256 / 6 heads) ---
N_EMBD = 32          # C
BLOCK_SIZE = 8       # max sequence length (== T here)
NUM_HEADS = 4        # H
HEAD_SIZE = N_EMBD // NUM_HEADS   # 8


def _mha_kernel(x_ref, wq_ref, wk_ref, wv_ref, wp_ref, bp_ref, o_ref, *, T, H, Hs):
    """One grid step = one batch element: fused QKV, batched causal attention,
    fused concat+output-projection, single lane-dense store."""
    C = H * Hs
    neg_big = jnp.float32(-1e30)

    x = x_ref[0]                                        # (T, C)
    xb = jnp.broadcast_to(x[None], (H, T, C))           # head-batched view (hoisted once)

    # Head-batched projections (leading batch dim -> standard Mosaic batched matmul,
    # no narrow lane slices, no transposes). wq is pre-scaled by C**-0.5 in the wrapper.
    q = jnp.einsum('htc,hcd->htd', xb, wq_ref[...], preferred_element_type=jnp.float32)
    k = jnp.einsum('htc,hcd->htd', xb, wk_ref[...], preferred_element_type=jnp.float32)
    v = jnp.einsum('htc,hcd->htd', xb, wv_ref[...], preferred_element_type=jnp.float32)

    # All heads' (T, T) score tiles in one batched contraction.
    s = jnp.einsum('hqd,hkd->hqk', q, k, preferred_element_type=jnp.float32)   # (H, T, T)

    # Causal mask shared across heads (finite large negative -> robust softmax).
    row = lax.broadcasted_iota(jnp.int32, (T, T), 0)
    col = lax.broadcasted_iota(jnp.int32, (T, T), 1)
    s = jnp.where((col <= row)[None], s, neg_big)

    # One numerically-stable softmax pass over all heads; exact divide on the
    # small (H, T, 1) denominator keeps parity with the PyTorch module.
    s = s - jnp.max(s, axis=-1, keepdims=True)
    p = jnp.exp(s)
    p = p / jnp.sum(p, axis=-1, keepdims=True)

    # Context per head, then concat + output projection fused as one head-batched
    # matmul against wp reshaped (H, Hs, C), summed over heads.  No (T, Hs)
    # column stores, no VMEM ctx scratch.
    ctx = jnp.einsum('hqk,hkd->hqd', p, v, preferred_element_type=jnp.float32)       # (H, T, Hs)
    out = jnp.einsum('hqd,hdc->hqc', ctx, wp_ref[...],
                     preferred_element_type=jnp.float32)                             # (H, T, C)
    out = jnp.sum(out, axis=0) + bp_ref[...]                                         # (T, C)

    o_ref[0] = out.astype(o_ref.dtype)


def multi_head_attention(x, wq, wk, wv, wp, bp):
    """x: (B, T, C); wq/wk/wv: (H, C, Hs); wp: (C, C) [in, out]; bp: (1, C)."""
    B, T, C = x.shape
    H, _, Hs = wq.shape

    # Fold the attention scale (C**-0.5, as in the PyTorch Head.forward) into the
    # query weights: one-time weight-side transform, removes the in-kernel multiply.
    wq_s = wq * (C ** (-0.5))
    # Output projection restacked per head: wp rows are head-major (concat order),
    # so wp.reshape(H, Hs, C) lines each head's context up with its row block.
    wp3 = wp.reshape(H, Hs, C)

    kernel = functools.partial(_mha_kernel, T=T, H=H, Hs=Hs)

    out = pl.pallas_call(
        kernel,
        out_shape=jax.ShapeDtypeStruct((B, T, C), x.dtype),
        grid=(B,),
        in_specs=[
            pl.BlockSpec((1, T, C), lambda b: (b, 0, 0)),      # per-batch row slab of x
            pl.BlockSpec((H, C, Hs), lambda b: (0, 0, 0)),     # weights stay resident
            pl.BlockSpec((H, C, Hs), lambda b: (0, 0, 0)),
            pl.BlockSpec((H, C, Hs), lambda b: (0, 0, 0)),
            pl.BlockSpec((H, Hs, C), lambda b: (0, 0, 0)),
            pl.BlockSpec((1, C), lambda b: (0, 0)),
        ],
        out_specs=pl.BlockSpec((1, T, C), lambda b: (b, 0, 0)),
        compiler_params=pltpu.CompilerParams(
            dimension_semantics=("parallel",)),                # v7x: one batch per TC
    )(x, wq_s, wk, wv, wp3, bp)
    return out


def _reference(x, wq, wk, wv, wp, bp):
    """Plain-JAX reference matching the PyTorch forward (eval mode)."""
    B, T, C = x.shape
    scale = C ** (-0.5)
    causal = jnp.tril(jnp.ones((T, T), dtype=bool))
    outs = []
    for h in range(wq.shape[0]):
        q = x @ wq[h]
        k = x @ wk[h]
        v = x @ wv[h]
        wei = (q @ jnp.swapaxes(k, -2, -1)) * scale
        wei = jnp.where(causal[None], wei, -jnp.inf)
        wei = jax.nn.softmax(wei, axis=-1)
        outs.append(wei @ v)
    cat = jnp.concatenate(outs, axis=-1)
    return cat @ wp + bp[0]


if __name__ == "__main__":
    B, T, C, H, Hs = 2, BLOCK_SIZE, N_EMBD, NUM_HEADS, HEAD_SIZE

    key = jax.random.PRNGKey(0)
    kx, kq, kk, kv, kp, kb = jax.random.split(key, 6)

    x = jax.random.normal(kx, (B, T, C), dtype=jnp.float32)
    # nn.Linear(n_embd, head_size, bias=False) weight is (Hs, C); we store the
    # transpose (C, Hs) per head so the kernel does y = x @ W directly.
    wq = jax.random.normal(kq, (H, C, Hs), dtype=jnp.float32) * 0.02
    wk = jax.random.normal(kk, (H, C, Hs), dtype=jnp.float32) * 0.02
    wv = jax.random.normal(kv, (H, C, Hs), dtype=jnp.float32) * 0.02
    # proj: nn.Linear(n_embd, n_embd) -> stored as (C_in, C_out).
    wp = jax.random.normal(kp, (C, C), dtype=jnp.float32) * 0.02
    bp = jax.random.normal(kb, (1, C), dtype=jnp.float32) * 0.02

    out = multi_head_attention(x, wq, wk, wv, wp, bp)
    out = jax.block_until_ready(out)

    ref = _reference(x, wq, wk, wv, wp, bp)
    assert out.shape == (B, T, C)
    assert jnp.allclose(out, ref, atol=1e-4, rtol=1e-4), "mismatch vs reference"

    print("KERNEL_OK")
</pallas_src>

<mosaic_0001>
module attributes {stable_mosaic.version = 11 : i64} {
  func.func @_mha_kernel(%arg0: i32, %arg1: memref<1x8x32xf32, #tpu.memory_space<vmem>>, %arg2: memref<4x32x8xf32, #tpu.memory_space<vmem>>, %arg3: memref<4x32x8xf32, #tpu.memory_space<vmem>>, %arg4: memref<4x32x8xf32, #tpu.memory_space<vmem>>, %arg5: memref<4x8x32xf32, #tpu.memory_space<vmem>>, %arg6: memref<1x32xf32, #tpu.memory_space<vmem>>, %arg7: memref<1x8x32xf32, #tpu.memory_space<vmem>>) attributes {dimension_semantics = [#tpu.dimension_semantics<parallel>], iteration_bounds = array<i64: 2>, scalar_prefetch = 0 : i64, scratch_operands = 0 : i64, tpu.core_type = #tpu.core_type<tc>, window_params = [{transform_indices = @transform_0, window_bounds = array<i64: 1, 8, 32>}, {pipeline_mode = #tpu.pipeline_mode<synchronous>, transform_indices = @transform_1, window_bounds = array<i64: 4, 32, 8>}, {pipeline_mode = #tpu.pipeline_mode<synchronous>, transform_indices = @transform_2, window_bounds = array<i64: 4, 32, 8>}, {pipeline_mode = #tpu.pipeline_mode<synchronous>, transform_indices = @transform_3, window_bounds = array<i64: 4, 32, 8>}, {pipeline_mode = #tpu.pipeline_mode<synchronous>, transform_indices = @transform_4, window_bounds = array<i64: 4, 8, 32>}, {pipeline_mode = #tpu.pipeline_mode<synchronous>, transform_indices = @transform_5, window_bounds = array<i64: 1, 32>}, {transform_indices = @transform_6, window_bounds = array<i64: 1, 8, 32>}]} {
    %c0 = arith.constant 0 : index
    %c0_0 = arith.constant 0 : index
    %c0_1 = arith.constant 0 : index
    %0 = vector.load %arg1[%c0, %c0_0, %c0_1] : memref<1x8x32xf32, #tpu.memory_space<vmem>>, vector<1x8x32xf32>
    %1 = vector.shape_cast %0 : vector<1x8x32xf32> to vector<8x32xf32>
    %2 = vector.shape_cast %1 : vector<8x32xf32> to vector<1x8x32xf32>
    %3 = vector.shape_cast %2 : vector<1x8x32xf32> to vector<1x8x32xf32>
    %4 = vector.broadcast %3 : vector<1x8x32xf32> to vector<4x8x32xf32>
    %c0_2 = arith.constant 0 : index
    %c0_3 = arith.constant 0 : index
    %c0_4 = arith.constant 0 : index
    %5 = vector.load %arg2[%c0_2, %c0_3, %c0_4] : memref<4x32x8xf32, #tpu.memory_space<vmem>>, vector<4x32x8xf32>
    "tpu.trace_start"() <{level = 10 : i32, message = "htc,hcd->htd"}> : () -> ()
    %cst = arith.constant dense<0.000000e+00> : vector<4x8x8xf32>
    %6 = tpu.matmul %4, %5, %cst {dimension_numbers = #tpu.dot_dimension_numbers<[2], [1], [1], [2], [0, 0, 0, 1, 1, 2], [0], [0]>} : vector<4x8x32xf32>, vector<4x32x8xf32>, vector<4x8x8xf32> -> vector<4x8x8xf32>
    "tpu.trace_stop"() : () -> ()
    %c0_5 = arith.constant 0 : index
    %c0_6 = arith.constant 0 : index
    %c0_7 = arith.constant 0 : index
    %7 = vector.load %arg3[%c0_5, %c0_6, %c0_7] : memref<4x32x8xf32, #tpu.memory_space<vmem>>, vector<4x32x8xf32>
    "tpu.trace_start"() <{level = 10 : i32, message = "htc,hcd->htd"}> : () -> ()
    %cst_8 = arith.constant dense<0.000000e+00> : vector<4x8x8xf32>
    %8 = tpu.matmul %4, %7, %cst_8 {dimension_numbers = #tpu.dot_dimension_numbers<[2], [1], [1], [2], [0, 0, 0, 1, 1, 2], [0], [0]>} : vector<4x8x32xf32>, vector<4x32x8xf32>, vector<4x8x8xf32> -> vector<4x8x8xf32>
    "tpu.trace_stop"() : () -> ()
    %c0_9 = arith.constant 0 : index
    %c0_10 = arith.constant 0 : index
    %c0_11 = arith.constant 0 : index
    %9 = vector.load %arg4[%c0_9, %c0_10, %c0_11] : memref<4x32x8xf32, #tpu.memory_space<vmem>>, vector<4x32x8xf32>
    "tpu.trace_start"() <{level = 10 : i32, message = "htc,hcd->htd"}> : () -> ()
    %cst_12 = arith.constant dense<0.000000e+00> : vector<4x8x8xf32>
    %10 = tpu.matmul %4, %9, %cst_12 {dimension_numbers = #tpu.dot_dimension_numbers<[2], [1], [1], [2], [0, 0, 0, 1, 1, 2], [0], [0]>} : vector<4x8x32xf32>, vector<4x32x8xf32>, vector<4x8x8xf32> -> vector<4x8x8xf32>
    "tpu.trace_stop"() : () -> ()
    "tpu.trace_start"() <{level = 10 : i32, message = "hqd,hkd->hqk"}> : () -> ()
    %cst_13 = arith.constant dense<0.000000e+00> : vector<4x8x8xf32>
    %11 = tpu.matmul %6, %8, %cst_13 {dimension_numbers = #tpu.dot_dimension_numbers<[2], [2], [1], [1], [0, 0, 0, 1, 1, 1], [0], [0]>} : vector<4x8x8xf32>, vector<4x8x8xf32>, vector<4x8x8xf32> -> vector<4x8x8xf32>
    "tpu.trace_stop"() : () -> ()
    %12 = tpu.iota {dimensions = array<i32: 0>} : vector<8x8xi32>
    %13 = tpu.iota {dimensions = array<i32: 1>} : vector<8x8xi32>
    %14 = arith.cmpi sle, %13, %12 : vector<8x8xi32>
    %15 = vector.shape_cast %14 : vector<8x8xi1> to vector<1x8x8xi1>
    %cst_14 = arith.constant -1.000000e+30 : f32
    %16 = vector.shape_cast %15 : vector<1x8x8xi1> to vector<1x8x8xi1>
    %17 = vector.broadcast %16 : vector<1x8x8xi1> to vector<4x8x8xi1>
    %18 = vector.broadcast %cst_14 : f32 to vector<4x8x8xf32>
    %19 = arith.select %17, %11, %18 : vector<4x8x8xi1>, vector<4x8x8xf32>
    %cst_15 = arith.constant dense<0xFF800000> : vector<4x8xf32>
    %20 = vector.multi_reduction <maximumf>, %19, %cst_15 [2] : vector<4x8x8xf32> to vector<4x8xf32>
    %21 = vector.shape_cast %20 : vector<4x8xf32> to vector<4x8x1xf32>
    %22 = vector.broadcast %21 : vector<4x8x1xf32> to vector<4x8x8xf32>
    %23 = arith.subf %19, %22 : vector<4x8x8xf32>
    %24 = math.exp %23 : vector<4x8x8xf32>
    %cst_16 = arith.constant dense<0.000000e+00> : vector<4x8xf32>
    %25 = vector.multi_reduction <add>, %24, %cst_16 [2] : vector<4x8x8xf32> to vector<4x8xf32>
    %26 = vector.shape_cast %25 : vector<4x8xf32> to vector<4x8x1xf32>
    %27 = vector.broadcast %26 : vector<4x8x1xf32> to vector<4x8x8xf32>
    %28 = arith.divf %24, %27 : vector<4x8x8xf32>
    "tpu.trace_start"() <{level = 10 : i32, message = "hqk,hkd->hqd"}> : () -> ()
    %cst_17 = arith.constant dense<0.000000e+00> : vector<4x8x8xf32>
    %29 = tpu.matmul %28, %10, %cst_17 {dimension_numbers = #tpu.dot_dimension_numbers<[2], [1], [1], [2], [0, 0, 0, 1, 1, 2], [0], [0]>} : vector<4x8x8xf32>, vector<4x8x8xf32>, vector<4x8x8xf32> -> vector<4x8x8xf32>
    "tpu.trace_stop"() : () -> ()
    %c0_18 = arith.constant 0 : index
    %c0_19 = arith.constant 0 : index
    %c0_20 = arith.constant 0 : index
    %30 = vector.load %arg5[%c0_18, %c0_19, %c0_20] : memref<4x8x32xf32, #tpu.memory_space<vmem>>, vector<4x8x32xf32>
    "tpu.trace_start"() <{level = 10 : i32, message = "hqd,hdc->hqc"}> : () -> ()
    %cst_21 = arith.constant dense<0.000000e+00> : vector<4x8x32xf32>
    %31 = tpu.matmul %29, %30, %cst_21 {dimension_numbers = #tpu.dot_dimension_numbers<[2], [1], [1], [2], [0, 0, 0, 1, 1, 2], [0], [0]>} : vector<4x8x8xf32>, vector<4x8x32xf32>, vector<4x8x32xf32> -> vector<4x8x32xf32>
    "tpu.trace_stop"() : () -> ()
    %cst_22 = arith.constant dense<0.000000e+00> : vector<8x32xf32>
    %32 = vector.multi_reduction <add>, %31, %cst_22 [0] : vector<4x8x32xf32> to vector<8x32xf32>
    %c0_23 = arith.constant 0 : index
    %c0_24 = arith.constant 0 : index
    %33 = vector.load %arg6[%c0_23, %c0_24] : memref<1x32xf32, #tpu.memory_space<vmem>>, vector<1x32xf32>
    %34 = vector.broadcast %33 : vector<1x32xf32> to vector<8x32xf32>
    %35 = arith.addf %32, %34 : vector<8x32xf32>
    %c0_25 = arith.constant 0 : index
    %c0_26 = arith.constant 0 : index
    %c0_27 = arith.constant 0 : index
    %36 = vector.load %arg7[%c0_25, %c0_26, %c0_27] : memref<1x8x32xf32, #tpu.memory_space<vmem>>, vector<1x8x32xf32>
    %37 = vector.shape_cast %36 : vector<1x8x32xf32> to vector<8x32xf32>
    %38 = vector.shape_cast %35 : vector<8x32xf32> to vector<1x8x32xf32>
    tpu.vector_store %arg7[%c0_25, %c0_26, %c0_27], %38 {strides = array<i32>} : memref<1x8x32xf32, #tpu.memory_space<vmem>>, vector<1x8x32xf32>,
    return
  }
  func.func @transform_0(%arg0: i32) -> (i32, i32, i32) {
    %c0_i32 = arith.constant 0 : i32
    %c0_i32_0 = arith.constant 0 : i32
    %c0_i32_1 = arith.constant 0 : i32
    return %arg0, %c0_i32, %c0_i32_0 : i32, i32, i32
  }
  func.func @transform_1(%arg0: i32) -> (i32, i32, i32) {
    %c0_i32 = arith.constant 0 : i32
    %c0_i32_0 = arith.constant 0 : i32
    %c0_i32_1 = arith.constant 0 : i32
    %c0_i32_2 = arith.constant 0 : i32
    return %c0_i32, %c0_i32_0, %c0_i32_1 : i32, i32, i32
  }
  func.func @transform_2(%arg0: i32) -> (i32, i32, i32) {
    %c0_i32 = arith.constant 0 : i32
    %c0_i32_0 = arith.constant 0 : i32
    %c0_i32_1 = arith.constant 0 : i32
    %c0_i32_2 = arith.constant 0 : i32
    return %c0_i32, %c0_i32_0, %c0_i32_1 : i32, i32, i32
  }
  func.func @transform_3(%arg0: i32) -> (i32, i32, i32) {
    %c0_i32 = arith.constant 0 : i32
    %c0_i32_0 = arith.constant 0 : i32
    %c0_i32_1 = arith.constant 0 : i32
    %c0_i32_2 = arith.constant 0 : i32
    return %c0_i32, %c0_i32_0, %c0_i32_1 : i32, i32, i32
  }
  func.func @transform_4(%arg0: i32) -> (i32, i32, i32) {
    %c0_i32 = arith.constant 0 : i32
    %c0_i32_0 = arith.constant 0 : i32
    %c0_i32_1 = arith.constant 0 : i32
    %c0_i32_2 = arith.constant 0 : i32
    return %c0_i32, %c0_i32_0, %c0_i32_1 : i32, i32, i32
  }
  func.func @transform_5(%arg0: i32) -> (i32, i32) {
    %c0_i32 = arith.constant 0 : i32
    %c0_i32_0 = arith.constant 0 : i32
    %c0_i32_1 = arith.constant 0 : i32
    return %c0_i32, %c0_i32_0 : i32, i32
  }
  func.func @transform_6(%arg0: i32) -> (i32, i32, i32) {
    %c0_i32 = arith.constant 0 : i32
    %c0_i32_0 = arith.constant 0 : i32
    %c0_i32_1 = arith.constant 0 : i32
    return %arg0, %c0_i32, %c0_i32_0 : i32, i32, i32
  }
}

</mosaic_0001>

<bundles_post_ra>
// kernel: tpu_custom_call.1
= control target key start
LH: loop header
LB: loop body
LE: loop exit
PB: predicated region body
PF: predicated region fallthrough
CT: control target
= control target key end

     0   :  { %11 = vsyncpa [#allocation3], 0  ;;  %s3133_s0 = inlined_call_operand.vmem [shape: f32[2,8,32], index: 0, kind: input, shape index: {}]   ;;  %s3134_s1 = inlined_call_operand.vmem [shape: f32[4,32,8], index: 1, kind: input, shape index: {}]   ;;  %s3135_s2 = inlined_call_operand.vmem [shape: f32[4,32,8], index: 2, kind: input, shape index: {}]   ;;  %s3136_s3 = inlined_call_operand.vmem [shape: f32[4,32,8], index: 3, kind: input, shape index: {}]   ;;  %s3137_s4 = inlined_call_operand.vmem [shape: f32[4,8,32], index: 4, kind: input, shape index: {}]   ;;  %s3138_s5 = inlined_call_operand.vmem [shape: f32[1,32], index: 5, kind: input, shape index: {}]   ;;  %s3139_s6 = inlined_call_operand.hbm [shape: f32[2,8,32], index: 6, kind: output, shape index: {}]  }
   0x1   :  { %13 = vsyncpa [#allocation3 + $0x1], 0  ;;  %s2725_s21 = smov 0   ;;  %s2727_s22 = smov 0  }
   0x2   :  { %s2729_s23 = smov 0   ;;  %s2731_s24 = smov 0  }
   0x3 LB: > { %s2746_s25 = sadd.s32 4294967295, %s2684_s24   ;;  %s2177_s26 = sadd.s32 4294967294, %s2684_s24   ;;  %s2684_s24 = sphi %s2731_s24, %s3145_s24   ;;  %s2680_s23 = sphi %s2729_s23, %s3144_s23   ;;  %s2676_s22 = sphi %s2727_s22, %s3143_s22   ;;  %s2672_s21 = sphi %s2725_s21, %s3142_s21  }
   0x4   : > { %s2750_s27 = sadd.s32 1, %s2684_s24   ;;  %s157_s28 = sadd.s32 1, %s2680_s23 }
   0x5   : > { %s154_s29 = ssub.s32 %s2684_s24, %s2750_s27  ;;  %p167_p0 = scmp.ne.s32.totalorder %s2680_s23, %s2676_s22 }
   0x6   : > { %p155_p1 = scmp.eq.s32.totalorder %s154_s29, 0  ;;  %p168_p2 = scmp.eq.s32.totalorder %s2746_s25, 1 }
   0x7   : > { %p173_p3 = scmp.ne.s32.totalorder %s2676_s22, %s2672_s21  ;;  %p174_p4 = scmp.eq.s32.totalorder %s2177_s26, 1 }
   0x8   : > { %s2761_s30 = scalar_select %p155_p1, %s2680_s23, %s157_s28  }
   0x9   : > { %p2763_p5 = por %p168_p2, %p167_p0  ;;  %p2767_p6 = por %p174_p4, %p173_p3 }
   0xa   : > { %p2180_p7 = scmp.ge.s32.totalorder %s2684_s24, 1  ;;  %p214_p8 = scmp.lt.s32.totalorder %s2684_s24, 3 }
   0xc   : > { %p215_p9 = pnand %p2180_p7, %p214_p8 }
   0xd   : > { %v248_v0 = vld [vmem:[%s3134_s1] sm:$0xff] (!%p215_p9)  ;;  %v249_v1 = vld [vmem:[%s3134_s1 + $0x8] sm:$0xff] (!%p215_p9)  ;;  %v2686_v3 = vmov (!%p215_p9), 0.0|0.0   ;;  %v250_v6 = vld [vmem:[%s3134_s1 + $0x10] sm:$0xff] (!%p215_p9)  ;;  %p243_p10 = scmp.lt.s32.totalorder (!%p215_p9), %s2746_s25, 1  ;;  %vm2687_vm0 = vmmov (!%p215_p9), 0  }
   0xe   : > { %218 = sbr.rel (%p215_p9) target bundleno = 1239 (0x4d7), region = 44  ;;  %v252_v2 = vld [vmem:[%s3134_s1 + $0x20] sm:$0xff] (!%p215_p9)  ;;  %2492 = vmatprep.subr.bf16.mxu0 (!%p215_p9), %v2686_v3  ;;  %2498 = vmatprep.subr.bf16.mxu1 (!%p215_p9), %v2686_v3  ;;  %v2493_v4 = vpack.c.bf16 (!%p215_p9), %v249_v1, %v248_v0  ;;  %v253_v5 = vld [vmem:[%s3134_s1 + $0x28] sm:$0xff] (!%p215_p9)  ;;  %v251_v7 = vld [vmem:[%s3134_s1 + $0x18] sm:$0xff] (!%p215_p9)  ;;  %v2688_v11 = vmov (!%p215_p9), 0.0   ;;  %vm264_vm1 = vcmask (!%p215_p9), 261120  }
   0xf   : > { %v2499_v8 = vpack.c.bf16 (!%p215_p9), %v253_v5, %v252_v2  ;;  %v254_v9 = vld [vmem:[%s3134_s1 + $0x30] sm:$0xff] (!%p215_p9)  ;;  %v255_v10 = vld [vmem:[%s3134_s1 + $0x38] sm:$0xff] (!%p215_p9)  ;;  %2308 = vmatprep.mubr.msk.f32.mxu0 (!%p215_p9), %vm2687_vm0, %v2688_v11  ;;  %2319 = vmatprep.mubr.msk.f32.mxu1 (!%p215_p9), %vm2687_vm0, %v2688_v11  ;;  %v2496_v12 = vpack.c.bf16 (!%p215_p9), %v251_v7, %v250_v6  ;;  %v256_v14 = vld [vmem:[%s3134_s1 + $0x40] sm:$0xff] (!%p215_p9)  ;;  %vm1140_vm2 = vcmask (!%p215_p9), 64512   ;;  %s240_s13 = sand.u32 (!%p215_p9), 1, %s2676_s22   ;;  %s2213_s17 = sshll.u32 (!%p215_p9), %s2746_s25, 7 }
  0x10   : > { %2494 = vmatpush3.bf16.msra.mxu0 (!%p215_p9), %v2493_v4  ;;  %v2502_v13 = vpack.c.bf16 (!%p215_p9), %v255_v10, %v254_v9  ;;  %v257_v15 = vld [vmem:[%s3134_s1 + $0x48] sm:$0xff] (!%p215_p9)  ;;  %v260_v16 = vld [vmem:[%s3134_s1 + $0x60] sm:$0xff] (!%p215_p9)  ;;  %v258_v21 = vld [vmem:[%s3134_s1 + $0x50] sm:$0xff] (!%p215_p9)  ;;  %s2181_s14 = sshll.u32 (!%p215_p9), %s240_s13, 3  ;;  %s2105_s29 = scalar_lea.sflag (!%p215_p9), [#allocation3], %s240_s13 }
  0x11   : > { %2500 = vmatpush3.bf16.msra.mxu1 (!%p215_p9), %v2499_v8  ;;  %2495 = vmatprep.subr.bf16.mxu0 (!%p215_p9), %v2686_v3  ;;  %v261_v17 = vld [vmem:[%s3134_s1 + $0x68] sm:$0xff] (!%p215_p9)  ;;  %v2505_v19 = vpack.c.bf16 (!%p215_p9), %v257_v15, %v256_v14  ;;  %v259_v22 = vld [vmem:[%s3134_s1 + $0x58] sm:$0xff] (!%p215_p9)  ;;  %v262_v23 = vld [vmem:[%s3134_s1 + $0x70] sm:$0xff] (!%p215_p9)  ;;  %s242_s18 = scalar_lea.vmem (!%p215_p9), [#allocation2], %s2181_s14 }
  0x12   : > { %2501 = vmatprep.subr.bf16.mxu1 (!%p215_p9), %v2686_v3  ;;  %v2511_v20 = vpack.c.bf16 (!%p215_p9), %v261_v17, %v260_v16  ;;  %v263_v24 = vld [vmem:[%s3134_s1 + $0x78] sm:$0xff] (!%p215_p9)  ;;  %v2508_v25 = vpack.c.bf16 (!%p215_p9), %v259_v22, %v258_v21  ;;  %v548_v27 = vld [vmem:[%s3135_s2] sm:$0xff] (!%p215_p9)  ;;  %v549_v28 = vld [vmem:[%s3135_s2 + $0x8] sm:$0xff] (!%p215_p9)  ;;  %s2118_s19 = sshll.u32 (!%p215_p9), %s242_s18, 4  ;;  %s3092_s19 = int_to_ptr.vmem [resolvable:$true] %s2118_s19 }
  0x13   : > { %v2514_v26 = vpack.c.bf16 (!%p215_p9), %v263_v24, %v262_v23  ;;  %v552_v29 = vld [vmem:[%s3135_s2 + $0x20] sm:$0xff] (!%p215_p9)  ;;  %v553_v30 = vld [vmem:[%s3135_s2 + $0x28] sm:$0xff] (!%p215_p9)  ;;  %v2517_v31 = vpack.c.bf16 (!%p215_p9), %v549_v28, %v548_v27  ;;  %v550_v33 = vld [vmem:[%s3135_s2 + $0x10] sm:$0xff] (!%p215_p9)  ;;  %s2622_s9 = scalar_lea.vmem (!%p215_p9), %s3092_s19, 128 }
  0x14   : > { %2497 = vmatpush3.bf16.msra.mxu0 (!%p215_p9), %v2496_v12  ;;  %v2523_v32 = vpack.c.bf16 (!%p215_p9), %v553_v30, %v552_v29  ;;  %v551_v34 = vld [vmem:[%s3135_s2 + $0x18] sm:$0xff] (!%p215_p9)  ;;  %v554_v35 = vld [vmem:[%s3135_s2 + $0x30] sm:$0xff] (!%p215_p9)  ;;  %v556_v39 = vld [vmem:[%s3135_s2 + $0x40] sm:$0xff] (!%p215_p9)  ;;  %p2623_p11 = scmp.ne.s32.totalorder (!%p215_p9), %s3092_s19, %s2622_s9 }
  0x15   : > { %s244_s10 = scalar_select %p243_p10, %s2746_s25, 1  ;;  %2503 = vmatpush3.bf16.msra.mxu1 %v2502_v13  ;;  %2504 = vmatprep.subr.bf16.mxu0 %v2686_v3  ;;  %v555_v36 = vld [vmem:[%s3135_s2 + $0x38] sm:$0xff]  ;;  %v2520_v37 = vpack.c.bf16 %v551_v34, %v550_v33  ;;  %v557_v40 = vld [vmem:[%s3135_s2 + $0x48] sm:$0xff]  ;;  %v560_v41 = vld [vmem:[%s3135_s2 + $0x60] sm:$0xff] }
  0x16   : > { %2510 = vmatprep.subr.bf16.mxu1 %v2686_v3  ;;  %v2526_v38 = vpack.c.bf16 %v555_v36, %v554_v35  ;;  %v561_v42 = vld [vmem:[%s3135_s2 + $0x68] sm:$0xff]  ;;  %v2529_v43 = vpack.c.bf16 %v557_v40, %v556_v39  ;;  %v558_v45 = vld [vmem:[%s3135_s2 + $0x50] sm:$0xff]  ;;  %v559_v46 = vld [vmem:[%s3135_s2 + $0x58] sm:$0xff]  ;;  %v1445_v36 = vlaneseq  ;;  %p2624_p12 = pnand %p2623_p11, %p2763_p5  ;;  %s2689_s25 = smov [#allocation2]  }
  0x17   : > { %s2182_s15 = sshll.u32 %s244_s10, 3  ;;  %v2535_v44 = vpack.c.bf16 %v561_v42, %v560_v41  ;;  %v562_v47 = vld [vmem:[%s3135_s2 + $0x70] sm:$0xff]  ;;  %v563_v48 = vld [vmem:[%s3135_s2 + $0x78] sm:$0xff]  ;;  %v2532_v49 = vpack.c.bf16 %v559_v46, %v558_v45  ;;  %v844_v51 = vld [vmem:[%s3136_s3] sm:$0xff]  ;;  %s2626_s10 = sshll.u32 %s2689_s25, 4  ;;  %s2627_s10 = int_to_ptr.vmem [resolvable:$false] %s2626_s10 }
  0x18   : > { %s246_s28 = scalar_lea.vmem %s3133_s0, %s2182_s15  ;;  %v2538_v50 = vpack.c.bf16 %v563_v48, %v562_v47  ;;  %v845_v52 = vld [vmem:[%s3136_s3 + $0x8] sm:$0xff]  ;;  %v848_v53 = vld [vmem:[%s3136_s3 + $0x20] sm:$0xff]  ;;  %v846_v57 = vld [vmem:[%s3136_s3 + $0x10] sm:$0xff]  ;;  %p2625_p13 = pneg %p2624_p12 }
  0x19   : > { %v2822_v18 = vld [vmem:[%s246_s28] sm:$0xff]  ;;  %v849_v54 = vld [vmem:[%s3136_s3 + $0x28] sm:$0xff]  ;;  %v2541_v55 = vpack.c.bf16 %v845_v52, %v844_v51  ;;  %v847_v58 = vld [vmem:[%s3136_s3 + $0x18] sm:$0xff]  ;;  %s3090_s28 = scalar_lea.hbm %s3139_s6, %s2213_s17  ;;  %s2628_s11 = scalar_lea.vmem %s2627_s10, 256 }
  0x1a   : > { %2309 = vmatmul.mubr.msk.f32.vlgmr.msra.gmra.mrb[0].mxu0 %vm264_vm1, %v2822_v18  ;;  %2320 = vmatmul.mubr.msk.f32.vlgmr.msra.gmra.mrb[0].mxu1 %vm264_vm1, %v2822_v18  ;;  %v2547_v56 = vpack.c.bf16 %v849_v54, %v848_v53  ;;  %v850_v59 = vld [vmem:[%s3136_s3 + $0x30] sm:$0xff]  ;;  %v2544_v60 = vpack.c.bf16 %v847_v58, %v846_v57  ;;  %v851_v61 = vld [vmem:[%s3136_s3 + $0x38] sm:$0xff]  ;;  %v852_v63 = vld [vmem:[%s3136_s3 + $0x40] sm:$0xff]  ;;  %p2629_p0 = scmp.lt.s32.totalorder %s3092_s19, %s2627_s10  ;;  %p2630_p1 = scmp.lt.s32.totalorder %s2628_s11, %s2622_s9 }
  0x1b   : > { %2506 = vmatpush3.bf16.msra.mxu0 %v2505_v19  ;;  %2512 = vmatpush3.bf16.msra.mxu1 %v2511_v20  ;;  %v2550_v62 = vpack.c.bf16 %v851_v61, %v850_v59  ;;  %v853_v0 = vld [vmem:[%s3136_s3 + $0x48] sm:$0xff]  ;;  %v856_v1 = vld [vmem:[%s3136_s3 + $0x60] sm:$0xff]  ;;  %v854_v6 = vld [vmem:[%s3136_s3 + $0x50] sm:$0xff] }
  0x1c   : > { %2507 = vmatprep.subr.bf16.mxu0 %v2686_v3  ;;  %2513 = vmatprep.subr.bf16.mxu1 %v2686_v3  ;;  %v2553_v2 = vpack.c.bf16 %v853_v0, %v852_v63  ;;  %v857_v4 = vld [vmem:[%s3136_s3 + $0x68] sm:$0xff]  ;;  %v855_v7 = vld [vmem:[%s3136_s3 + $0x58] sm:$0xff]  ;;  %v858_v8 = vld [vmem:[%s3136_s3 + $0x70] sm:$0xff]  ;;  %p2631_p2 = por %p2630_p1, %p2629_p0 }
  0x1d   : > { %2330 = vmatprep.mubr.msk.f32.mxu0 %vm2687_vm0, %v2688_v11  ;;  %2341 = vmatprep.mubr.msk.f32.mxu1 %vm2687_vm0, %v2688_v11  ;;  %v2559_v5 = vpack.c.bf16 %v857_v4, %v856_v1  ;;  %v2556_v9 = vpack.c.bf16 %v855_v7, %v854_v6  ;;  %v859_v10 = vld [vmem:[%s3136_s3 + $0x78] sm:$0xff] }
  0x1e   : > { %v2562_v12 = vpack.c.bf16 %v859_v10, %v858_v8  ;;  %p2632_p3 = pnand %p2631_p2, %p2625_p13 }
  0x1f   : > { %2509 = vmatpush3.bf16.msra.mxu0 %v2508_v25  ;;  %2515 = vmatpush3.bf16.msra.mxu1 %v2514_v26 }
  0x20   : > { %2516 = vmatprep.subr.bf16.mxu0 %v2686_v3  ;;  %2522 = vmatprep.subr.bf16.mxu1 %v2686_v3 }
  0x22   : > { %2331 = vmatmul.mubr.msk.f32.vlgmr.msra.gmra.mrb[2].mxu0 %vm264_vm1, %v2822_v18  ;;  %2342 = vmatmul.mubr.msk.f32.vlgmr.msra.gmra.mrb[2].mxu1 %vm264_vm1, %v2822_v18 }
  0x23   : > { %2518 = vmatpush3.bf16.msra.mxu0 %v2517_v31  ;;  %2524 = vmatpush3.bf16.msra.mxu1 %v2523_v32 }
  0x24   : > { %2519 = vmatprep.subr.bf16.mxu0 %v2686_v3  ;;  %2525 = vmatprep.subr.bf16.mxu1 %v2686_v3 }
  0x25   : > { %2352 = vmatprep.mubr.msk.f32.mxu0 %vm2687_vm0, %v2688_v11  ;;  %2363 = vmatprep.mubr.msk.f32.mxu1 %vm2687_vm0, %v2688_v11 }
  0x27   : > { %2521 = vmatpush3.bf16.msra.mxu0 %v2520_v37  ;;  %2527 = vmatpush3.bf16.msra.mxu1 %v2526_v38  ;;  %v1446_v37 = vshrl.u32 %v1445_v36, 7  ;;  %v1448_v38 = vand.u32 127, %v1445_v36 }
  0x28   : > { %2528 = vmatprep.subr.bf16.mxu0 %v2686_v3  ;;  %2534 = vmatprep.subr.bf16.mxu1 %v2686_v3 }
  0x29   : > { %vm1449_vm3 = vcmp.le.s32.totalorder %v1448_v38, %v1446_v37 }
  0x2a   : > { %2353 = vmatmul.mubr.msk.f32.vlgmr.msra.gmra.mrb[4].mxu0 %vm264_vm1, %v2822_v18  ;;  %2364 = vmatmul.mubr.msk.f32.vlgmr.msra.gmra.mrb[4].mxu1 %vm264_vm1, %v2822_v18 }
  0x2b   : > { %2530 = vmatpush3.bf16.msra.mxu0 %v2529_v43  ;;  %2536 = vmatpush3.bf16.msra.mxu1 %v2535_v44 }
  0x2c   : > { %2531 = vmatprep.subr.bf16.mxu0 %v2686_v3  ;;  %2537 = vmatprep.subr.bf16.mxu1 %v2686_v3 }
  0x2d   : > { %2374 = vmatprep.mubr.msk.f32.mxu0 %vm2687_vm0, %v2688_v11  ;;  %2385 = vmatprep.mubr.msk.f32.mxu1 %vm2687_vm0, %v2688_v11 }
  0x2f   : > { %2533 = vmatpush3.bf16.msra.mxu0 %v2532_v49  ;;  %2539 = vmatpush3.bf16.msra.mxu1 %v2538_v50 }
  0x30   : > { %2540 = vmatprep.subr.bf16.mxu0 %v2686_v3  ;;  %2546 = vmatprep.subr.bf16.mxu1 %v2686_v3 }
  0x32   : > { %2375 = vmatmul.mubr.msk.f32.vlgmr.msra.gmra.mrb[6].mxu0 %vm264_vm1, %v2822_v18  ;;  %2386 = vmatmul.mubr.msk.f32.vlgmr.msra.gmra.mrb[6].mxu1 %vm264_vm1, %v2822_v18 }
  0x33   : > { %2542 = vmatpush3.bf16.msra.mxu0 %v2541_v55  ;;  %2548 = vmatpush3.bf16.msra.mxu1 %v2547_v56 }
  0x34   : > { %2543 = vmatprep.subr.bf16.mxu0 %v2686_v3  ;;  %2549 = vmatprep.subr.bf16.mxu1 %v2686_v3 }
  0x35   : > { %2396 = vmatprep.mubr.msk.f32.mxu0 %vm2687_vm0, %v2688_v11  ;;  %2407 = vmatprep.mubr.msk.f32.mxu1 %vm2687_vm0, %v2688_v11 }
  0x37   : > { %2545 = vmatpush3.bf16.msra.mxu0 %v2544_v60  ;;  %2551 = vmatpush3.bf16.msra.mxu1 %v2550_v62 }
  0x38   : > { %2552 = vmatprep.subr.bf16.mxu0 %v2686_v3  ;;  %2558 = vmatprep.subr.bf16.mxu1 %v2686_v3 }
  0x3a   : > { %2397 = vmatmul.mubr.msk.f32.vlgmr.msra.gmra.mrb[8].mxu0 %vm264_vm1, %v2822_v18  ;;  %2408 = vmatmul.mubr.msk.f32.vlgmr.msra.gmra.mrb[8].mxu1 %vm264_vm1, %v2822_v18 }
  0x3b   : > { %2554 = vmatpush3.bf16.msra.mxu0 %v2553_v2  ;;  %2560 = vmatpush3.bf16.msra.mxu1 %v2559_v5 }
  0x3c   : > { %2555 = vmatprep.subr.bf16.mxu0 %v2686_v3  ;;  %2561 = vmatprep.subr.bf16.mxu1 %v2686_v3 }
  0x3d   : > { %2418 = vmatprep.mubr.msk.f32.mxu0 %vm2687_vm0, %v2688_v11  ;;  %2429 = vmatprep.mubr.msk.f32.mxu1 %vm2687_vm0, %v2688_v11 }
  0x3f   : > { %2557 = vmatpush3.bf16.msra.mxu0 %v2556_v9  ;;  %2563 = vmatpush3.bf16.msra.mxu1 %v2562_v12 }
  0x40   : > { %2432 = vmatprep.subr.mxu0 %v2688_v11  ;;  %2437 = vmatprep.subr.mxu1 %v2688_v11 }
  0x42   : > { %2419 = vmatmul.mubr.msk.f32.vlgmr.msra.gmra.mrb[10].mxu0 %vm264_vm1, %v2822_v18  ;;  %2430 = vmatmul.mubr.msk.f32.vlgmr.msra.gmra.mrb[10].mxu1 %vm264_vm1, %v2822_v18 }
  0x43   : > { %2434 = vmatprep.mubr.msk.f32.mxu0 %vm2687_vm0, %v2688_v11  ;;  %2439 = vmatprep.mubr.msk.f32.mxu1 %vm2687_vm0, %v2688_v11 }
  0xed   : > { %v334_v3 = vpop.f32.mrb[0].mxu0  ;;  %v404_v14 = vpop.f32.mrb[0].mxu1 }
  0xee   : > { %v2310_v13 = vpop.f32.mrb[1].mxu0  ;;  %v2321_v15 = vpop.f32.mrb[1].mxu1 }
  0xf5   : > { %v474_v16 = vpop.f32.mrb[2].mxu0  ;;  %v544_v19 = vpop.f32.mrb[2].mxu1 }
  0xf6   : > { %v2332_v17 = vpop.f32.mrb[3].mxu0  ;;  %v2343_v20 = vpop.f32.mrb[3].mxu1 }
  0xfd   : > { %v630_v21 = vpop.f32.mrb[4].mxu0  ;;  %v700_v22 = vpop.f32.mrb[4].mxu1 }
  0xfe   : > { %v2354_v23 = vpop.f32.mrb[5].mxu0  ;;  %2433 = vmatpush3.xpose.msk.msra.mxu0 %vm1140_vm2, %v630_v21  ;;  %2438 = vmatpush3.xpose.msk.msra.mxu1 %vm1140_vm2, %v700_v22  ;;  %v2365_v18 = vpop.f32.mrb[5].mxu1 }
  0xff   : > { %2442 = vmatprep.subr.mxu0 %v2688_v11  ;;  %2447 = vmatprep.subr.mxu1 %v2688_v11 }
 0x101   : > { %2435 = vmatmul.mubr.msk.f32.vlgmr.msra.gmra.mrb[12].mxu0 %vm1140_vm2, %v334_v3  ;;  %2440 = vmatmul.mubr.msk.f32.vlgmr.msra.gmra.mrb[12].mxu1 %vm1140_vm2, %v404_v14 }
 0x102   : > { %2444 = vmatprep.mubr.msk.f32.mxu0 %vm2687_vm0, %v2688_v11  ;;  %2449 = vmatprep.mubr.msk.f32.mxu1 %vm2687_vm0, %v2688_v11 }
 0x105   : > { %v770_v24 = vpop.f32.mrb[6].mxu0  ;;  %v840_v25 = vpop.f32.mrb[6].mxu1 }
 0x106   : > { %v2376_v26 = vpop.f32.mrb[7].mxu0  ;;  %2443 = vmatpush3.xpose.msk.msra.mxu0 %vm1140_vm2, %v770_v24  ;;  %2448 = vmatpush3.xpose.msk.msra.mxu1 %vm1140_vm2, %v840_v25  ;;  %v2387_v27 = vpop.f32.mrb[7].mxu1  ;;  %v1792_v24 = vld [vmem:[%s3137_s4] sm:$0xff]  ;;  %v1793_v25 = vld [vmem:[%s3137_s4 + $0x8] sm:$0xff] }
 0x107   : > { %2452 = vmatprep.subr.mxu0 %v2688_v11  ;;  %2457 = vmatprep.subr.mxu1 %v2688_v11  ;;  %v1794_v26 = vld [vmem:[%s3137_s4 + $0x10] sm:$0xff] }
 0x109   : > { %2445 = vmatmul.mubr.msk.f32.vlgmr.msra.gmra.mrb[14].mxu0 %vm1140_vm2, %v474_v16  ;;  %2450 = vmatmul.mubr.msk.f32.vlgmr.msra.gmra.mrb[14].mxu1 %vm1140_vm2, %v544_v19 }
 0x10a   : > { %2454 = vmatprep.mubr.msk.f32.mxu0 %vm2687_vm0, %v2688_v11  ;;  %2459 = vmatprep.mubr.msk.f32.mxu1 %vm2687_vm0, %v2688_v11 }
 0x10d   : > { %v926_v28 = vpop.f32.mrb[8].mxu0  ;;  %v996_v30 = vpop.f32.mrb[8].mxu1 }
 0x10e   : > { %v2398_v29 = vpop.f32.mrb[9].mxu0  ;;  %2453 = vmatpush3.msra.mxu0 %v926_v28  ;;  %v2409_v31 = vpop.f32.mrb[9].mxu1  ;;  %2458 = vmatpush3.msra.mxu1 %v996_v30 }
 0x10f   : > { %2462 = vmatprep.subr.mxu0 %v2688_v11  ;;  %2467 = vmatprep.subr.mxu1 %v2688_v11  ;;  %v1795_v29 = vld [vmem:[%s3137_s4 + $0x18] sm:$0xff] }
 0x115   : > { %v3024_v32 = vpop.f32.mrb[10].mxu0  ;;  %v3026_v33 = vpop.f32.mrb[10].mxu1 }
 0x116   : > { %v2420_v34 = vpop.f32.mrb[11].mxu0  ;;  %v2431_v35 = vpop.f32.mrb[11].mxu1 }
 0x1d4   : > { %v1213_v39 = vpop.f32.mrb[12].mxu0  ;;  %v1289_v41 = vpop.f32.mrb[12].mxu1 }
 0x1d5   : > { %v1452_v40 = vsel %vm1449_vm3, %v1213_v39, -1e+30  ;;  %v2436_v42 = vpop.f32.mrb[13].mxu0  ;;  %v2441_v43 = vpop.f32.mrb[13].mxu1  ;;  %v1453_v45 = vsel %vm1449_vm3, %v1289_v41, -1e+30 }
 0x1d6   : > { %v1456_v44 = vsel %vm1140_vm2, %v1452_v40, -inf  ;;  %v1459_v46 = vsel %vm1140_vm2, %v1453_v45, -inf }
 0x1d7   : > { %1457 = vmax.xlane.f32.xlu0 %v1456_v44 }
 0x1db   : > { %1460 = vmax.xlane.f32.xlu0 %v1459_v46 }
 0x1dc   : > { %v1365_v47 = vpop.f32.mrb[14].mxu0  ;;  %v1441_v49 = vpop.f32.mrb[14].mxu1 }
 0x1dd   : > { %v1454_v48 = vsel %vm1449_vm3, %v1365_v47, -1e+30  ;;  %v2446_v50 = vpop.f32.mrb[15].mxu0  ;;  %v2451_v51 = vpop.f32.mrb[15].mxu1  ;;  %v1455_v53 = vsel %vm1449_vm3, %v1441_v49, -1e+30 }
 0x1de   : > { %v1462_v52 = vsel %vm1140_vm2, %v1454_v48, -inf  ;;  %v1465_v54 = vsel %vm1140_vm2, %v1455_v53, -inf }
 0x1df   : > { %1463 = vmax.xlane.f32.xlu1 %v1462_v52 }
 0x1e3   : > { %1466 = vmax.xlane.f32.xlu1 %v1465_v54 }
 0x264   : > { %v1458_v55 = vpop.xlane.xlu0 %1457 }
 0x265   : > { %v1468_v56 = vsub.f32 %v1452_v40, %v1458_v55 }
 0x267   : > { %v1472_v57 = vmul.f32 1.442695, %v1468_v56 }
 0x268   : > { %v1461_v58 = vpop.xlane.xlu0 %1460 }
 0x269   : > { %2606 = vpow2.f32 %v1472_v57  ;;  %v1469_v59 = vsub.f32 %v1453_v45, %v1461_v58 }
 0x26b   : > { %v1474_v60 = vmul.f32 1.442695, %v1469_v59 }
 0x26c   : > { %v1464_v61 = vpop.xlane.xlu1 %1463 }
 0x26d   : > { %2608 = vpow2.f32 %v1474_v60  ;;  %v1470_v62 = vsub.f32 %v1454_v48, %v1464_v61  ;;  %v2211_v48 = vld [vmem:[%s3138_s5] ss:$0 sm:$0xff] }
 0x26f   : > { %v1476_v63 = vmul.f32 1.442695, %v1470_v62 }
 0x270   : > { %v1467_v0 = vpop.xlane.xlu1 %1466 }
 0x271   : > { %2610 = vpow2.f32 %v1476_v63  ;;  %v1471_v1 = vsub.f32 %v1455_v53, %v1467_v0 }
 0x273   : > { %v2607_v2 = vpop.eup %2606  ;;  %v1478_v4 = vmul.f32 1.442695, %v1471_v1 }
 0x274   : > { %v1480_v5 = vsel %vm1140_vm2, %v2607_v2, 0.0 }
 0x275   : > { %2612 = vpow2.f32 %v1478_v4  ;;  %1481 = vadd.xlane.f32.xlu0 %v1480_v5 }
 0x277   : > { %v2609_v6 = vpop.eup %2608 }
 0x278   : > { %v1483_v7 = vsel %vm1140_vm2, %v2609_v6, 0.0 }
 0x279   : > { %1484 = vadd.xlane.f32.xlu1 %v1483_v7 }
 0x27b   : > { %v2611_v8 = vpop.eup %2610 }
 0x27c   : > { %v1486_v9 = vsel %vm1140_vm2, %v2611_v8, 0.0 }
 0x27d   : > { %1487 = vadd.xlane.f32.xlu0 %v1486_v9 }
 0x27f   : > { %v2613_v10 = vpop.eup %2612 }
 0x280   : > { %v1489_v12 = vsel %vm1140_vm2, %v2613_v10, 0.0 }
 0x281   : > { %1490 = vadd.xlane.f32.xlu1 %v1489_v12 }
 0x302   : > { %v1482_v3 = vpop.xlane.xlu0 %1481 }
 0x303   : > { %2614 = vrcp.f32 %v1482_v3 }
 0x306   : > { %v1485_v13 = vpop.xlane.xlu1 %1484 }
 0x307   : > { %2616 = vrcp.f32 %v1485_v13 }
 0x30a   : > { %v1488_v14 = vpop.xlane.xlu0 %1487 }
 0x30b   : > { %2618 = vrcp.f32 %v1488_v14 }
 0x30d   : > { %v2615_v15 = vpop.eup %2614 }
 0x30e   : > { %v1493_v16 = vmul.f32 %v2615_v15, %v2607_v2  ;;  %v1491_v17 = vpop.xlane.xlu1 %1490 }
 0x30f   : > { %2620 = vrcp.f32 %v1491_v17 }
 0x310   : > { %2455 = vmatmul.mubr.msk.f32.vlgmr.msra.gmra.mrb[16].mxu0 %vm1140_vm2, %v1493_v16 }
 0x311   : > { %v2617_v19 = vpop.eup %2616  ;;  %2463 = vmatpush3.msra.mxu0 %v3024_v32  ;;  %2464 = vmatprep.mubr.msk.f32.mxu0 %vm2687_vm0, %v2688_v11 }
 0x312   : > { %v1495_v20 = vmul.f32 %v2617_v19, %v2609_v6  ;;  %2472 = vmatprep.subr.mxu0 %v2688_v11 }
 0x314   : > { %2460 = vmatmul.mubr.msk.f32.vlgmr.msra.gmra.mrb[16].mxu1 %vm1140_vm2, %v1495_v20 }
 0x315   : > { %v2619_v21 = vpop.eup %2618  ;;  %2468 = vmatpush3.msra.mxu1 %v3026_v33  ;;  %2469 = vmatprep.mubr.msk.f32.mxu1 %vm2687_vm0, %v2688_v11 }
 0x316   : > { %v1497_v22 = vmul.f32 %v2619_v21, %v2611_v8  ;;  %2477 = vmatprep.subr.mxu1 %v2688_v11 }
 0x318   : > { %2465 = vmatmul.mubr.msk.f32.vlgmr.msra.gmra.mrb[18].mxu0 %vm1140_vm2, %v1497_v22 }
 0x319   : > { %v2621_v23 = vpop.eup %2620  ;;  %2474 = vmatprep.mubr.msk.f32.mxu0 %vm2687_vm0, %v2688_v11  ;;  %2473 = vmatpush3.msra.mxu0 %v1792_v24 }
 0x31a   : > { %v1499_v18 = vmul.f32 %v2621_v23, %v2613_v10  ;;  %2482 = vmatprep.subr.mxu0 %v2688_v11 }
 0x31c   : > { %2470 = vmatmul.mubr.msk.f32.vlgmr.msra.gmra.mrb[18].mxu1 %vm1140_vm2, %v1499_v18 }
 0x31d   : > { %2479 = vmatprep.mubr.msk.f32.mxu1 %vm2687_vm0, %v2688_v11  ;;  %2478 = vmatpush3.msra.mxu1 %v1793_v25 }
 0x31e   : > { %2487 = vmatprep.subr.mxu1 %v2688_v11 }
 0x3e3   : > { %v1569_v27 = vpop.f32.mrb[16].mxu0 }
 0x3e4   : > { %v2456_v28 = vpop.f32.mrb[17].mxu0  ;;  %2475 = vmatmul.mubr.msk.f32.vlgmr.msra.gmra.mrb[20].mxu0 %vm1140_vm2, %v1569_v27 }
 0x3e5   : > { %2483 = vmatpush3.msra.mxu0 %v1794_v26  ;;  %2484 = vmatprep.mubr.msk.f32.mxu0 %vm2687_vm0, %v2688_v11 }
 0x3e7   : > { %v1642_v30 = vpop.f32.mrb[16].mxu1 }
 0x3e8   : > { %v2461_v31 = vpop.f32.mrb[17].mxu1  ;;  %2480 = vmatmul.mubr.msk.f32.vlgmr.msra.gmra.mrb[20].mxu1 %vm1140_vm2, %v1642_v30 }
 0x3e9   : > { %2488 = vmatpush3.msra.mxu1 %v1795_v29  ;;  %2489 = vmatprep.mubr.msk.f32.mxu1 %vm2687_vm0, %v2688_v11 }
 0x3eb   : > { %v1715_v32 = vpop.f32.mrb[18].mxu0 }
 0x3ec   : > { %v2466_v33 = vpop.f32.mrb[19].mxu0  ;;  %2485 = vmatmul.mubr.msk.f32.vlgmr.msra.gmra.mrb[22].mxu0 %vm1140_vm2, %v1715_v32 }
 0x3ef   : > { %v1788_v34 = vpop.f32.mrb[18].mxu1 }
 0x3f0   : > { %v2471_v35 = vpop.f32.mrb[19].mxu1  ;;  %2490 = vmatmul.mubr.msk.f32.vlgmr.msra.gmra.mrb[22].mxu1 %vm1140_vm2, %v1788_v34 }
 0x4b7   : > { %v1865_v36 = vpop.f32.mrb[20].mxu0 }
 0x4b8   : > { %v2476_v37 = vpop.f32.mrb[21].mxu0  ;;  %v2088_v39 = vsel %vm264_vm1, %v1865_v36, 0.0 }
 0x4bb   : > { %v1938_v38 = vpop.f32.mrb[20].mxu1 }
 0x4bc   : > { %v2089_v40 = vsel %vm264_vm1, %v1938_v38, 0.0  ;;  %v2481_v41 = vpop.f32.mrb[21].mxu1 }
 0x4bd   : > { %v2090_v42 = vadd.f32 %v2089_v40, %v2088_v39 }
 0x4bf   : > { %v2011_v11 = vpop.f32.mrb[22].mxu0 }
 0x4c0   : > { %v2091_v43 = vsel %vm264_vm1, %v2011_v11, 0.0  ;;  %v2486_v44 = vpop.f32.mrb[23].mxu0 }
 0x4c1   : > { %v2092_v45 = vadd.f32 %v2091_v43, %v2090_v42 }
 0x4c3   : > { %v2084_v46 = vpop.f32.mrb[22].mxu1 }
 0x4c4   : > { %v2093_v47 = vsel %vm264_vm1, %v2084_v46, 0.0  ;;  %v2491_v49 = vpop.f32.mrb[23].mxu1 }
 0x4c5   : > { %v2094_v50 = vadd.f32 %v2093_v47, %v2092_v45 }
 0x4c7   : > { %v2102_v51 = vadd.f32 %v2211_v48, %v2094_v50 }
 0x4c9   : > { %2103 = vst.msk [vmem:[%s242_s18] sm:$0xff] %vm264_vm1, %v2102_v51 }
 0x4ca   : > { %2635 = shalt.err (!%p2632_p3)
}
 0x4cb   : > { %s2636_s12 = scalar_lea.hbm %s3090_s28, 128  ;;  %s2640_s15 = scalar_lea.hbm %s3139_s6, 256 }
 0x4cc   : > { %p2637_p4 = scmp.ne.s32.totalorder %s3090_s28, %s2636_s12  ;;  %p2641_p9 = scmp.lt.u32.totalorder %s3090_s28, %s3139_s6 }
 0x4cd   : > { %p2642_p10 = scmp.lt.u32.totalorder %s2640_s15, %s2636_s12  ;;  %p2644_p12 = scmp.lt.u32.totalorder %s2636_s12, %s3090_s28 }
 0x4ce   : > { %p2638_p7 = pnand %p2637_p4, %p2763_p5 }
 0x4cf   : > { %p2643_p11 = por %p2642_p10, %p2641_p9 }
 0x4d0   : > { %p2639_p8 = pneg %p2638_p7 }
 0x4d1   : > { %p2645_p13 = por %p2644_p12, %p2643_p11 }
 0x4d3   : > { %p2646_p0 = pnand %p2645_p13, %p2639_p8 }
 0x4d5   : > { %2649 = shalt.err (!%p2646_p0)
}
 0x4d6   : > { %2564 = dma.vmem_to_hbm [thread:$0]  (%p2763_p5), %s3092_s19, 128, %s3090_s28, %s2105_s29  }
 0x4d7 PF: > { %p2570_p1 = scmp.ge.s32.totalorder %s2684_s24, 2  ;;  %s2130_s18 = sand.u32 1, %s2672_s21  }
 0x4d8   : > { %s2131_s20 = scalar_lea.sflag [#allocation3], %s2130_s18 }
 0x4d9   : > { %p2567_p2 = pnand %p2570_p1, %p2767_p6 }
 0x4db   : > { %2667 = dma.done.wait (!%p2567_p2), %s2131_s20, 128  }
 0x4dc   : > { %2669 = vsyncadd (!%p2567_p2), %s2131_s20, 4294967168  ;;  %p16_p3 = scmp.ge.s32.totalorder %s2750_s27, 4   ;;  %s3142_s21 = smov %s2676_s22 }
 0x4dd   : > { %s3143_s22 = smov %s2680_s23  ;;  %s3144_s23 = smov %s2761_s30 }
 0x4de   : > { %s3145_s24 = smov %s2750_s27  ;;  %18 = sbr.rel (!%p16_p3) target bundleno = 3 (0x3), region = 79 }
 0x4e5   :  { %2136 = vsyncpa [#allocation3], 1 }
 0x4e6   :  { %2138 = vsyncpa [#allocation3 + $0x1], 1 }

</bundles_post_ra>
